<compile_context>
chip_gen: v7x
topology: tpu7x:2x2x1
jax: 0.10.0
libtpu: 0.0.40
codegen_flags: <defaults>
</compile_context>

<pallas_src>
import functools

import jax
import jax.numpy as jnp
from jax import lax
from jax.experimental import pallas as pl
from jax.experimental.pallas import tpu as pltpu


def _mask_cols(v, start_col, bound):
    """Zero columns of v whose global column index is >= bound."""
    col = start_col + lax.broadcasted_iota(jnp.int32, v.shape, 1)
    return jnp.where(col < bound, v, jnp.zeros_like(v))


def _linear_sampled_acc_kernel(x_ref, w_ref, b_ref, o_ref, acc_ref, *,
                               emb_choice, super_emb, tk, mask_x, mask_w):
    k = pl.program_id(2)
    nk = pl.num_programs(2)

    @pl.when(k == 0)
    def _():
        acc_ref[...] = jnp.zeros_like(acc_ref)

    x = x_ref[...]
    w = w_ref[...]
    if mask_x:
        # Tail K block spills past the emb_choice prefix: zero those x columns
        # so they contribute nothing (weight columns there are finite params).
        x = _mask_cols(x, k * tk, emb_choice)
    if mask_w:
        # Tail K block spills past the array itself (OOB padding may hold
        # arbitrary bits): zero the weight columns too.
        w = _mask_cols(w, k * tk, super_emb)

    # x @ w.T without materializing a transpose: contract both last dims.
    acc_ref[...] += lax.dot_general(
        x, w,
        dimension_numbers=(((1,), (1,)), ((), ())),
        preferred_element_type=jnp.float32)

    @pl.when(k == nk - 1)
    def _():
        o_ref[...] = (acc_ref[...] + b_ref[...]).astype(o_ref.dtype)


def _linear_sampled_single_kernel(x_ref, w_ref, b_ref, o_ref, *,
                                  emb_choice, super_emb, mask_x, mask_w):
    # Whole reduction fits one K tile: no scratch accumulator needed.
    x = x_ref[...]
    w = w_ref[...]
    if mask_x:
        x = _mask_cols(x, 0, emb_choice)
    if mask_w:
        w = _mask_cols(w, 0, super_emb)
    acc = lax.dot_general(
        x, w,
        dimension_numbers=(((1,), (1,)), ((), ())),
        preferred_element_type=jnp.float32)
    o_ref[...] = (acc + b_ref[...]).astype(o_ref.dtype)


def _pick_tile(dim, preferred):
    # Full-extent blocks are always legal (any size); otherwise use the
    # (8,128)-aligned preferred tile and let Pallas handle the partial tail.
    return dim if dim <= preferred else preferred


def _pick_tk(emb_choice, super_emb, preferred=512):
    # Size K tiles from the *used* prefix, not the supernet width, so columns
    # past emb_choice are never DMA'd (except inside one 128-aligned tail).
    aligned = -(-emb_choice // 128) * 128
    if aligned >= super_emb:
        return super_emb          # full-extent block: always a legal shape
    return min(aligned, preferred)  # multiple of 128: legal regardless of dim


def linear_sampled(x, weight, bias, emb_choice, *, compute_dtype=None,
                   tm=None, tn=None, tk=None):
    """Pallas implementation of LinearSampled.forward.

    x:      (batch, super_emb)
    weight: (out_features, super_emb)   (torch.nn.Linear layout)
    bias:   (out_features,)
    emb_choice: static int, 0 < emb_choice <= super_emb
    compute_dtype: optional operand dtype for the MXU (e.g. jnp.bfloat16);
                   accumulation stays in float32, output keeps x's dtype.
    """
    B, super_emb = x.shape
    O, super_emb_w = weight.shape
    assert super_emb_w == super_emb
    emb_choice = int(emb_choice)
    assert 0 < emb_choice <= super_emb

    out_dtype = x.dtype
    if compute_dtype is not None:
        x = x.astype(compute_dtype)
        weight = weight.astype(compute_dtype)
    bias2d = bias.astype(jnp.float32).reshape(1, O)

    tm = tm if tm is not None else _pick_tile(B, 256)
    tn = tn if tn is not None else _pick_tile(O, 256)
    tk = tk if tk is not None else _pick_tk(emb_choice, super_emb, 512)

    gm = pl.cdiv(B, tm)
    gn = pl.cdiv(O, tn)
    gk = pl.cdiv(emb_choice, tk)        # only the emb_choice prefix is visited
    mask_x = gk * tk > emb_choice       # static: tail K block crosses prefix
    mask_w = gk * tk > super_emb        # static: tail K block crosses array

    itemsize = jnp.dtype(x.dtype).itemsize
    cost = pl.CostEstimate(
        flops=2 * B * emb_choice * O,
        transcendentals=0,
        bytes_accessed=(B * emb_choice + O * emb_choice) * itemsize
                       + O * 4 + B * O * jnp.dtype(out_dtype).itemsize)

    if gk == 1:
        # Single-K fast path: no accumulator scratch, 2-D grid.
        kernel = functools.partial(
            _linear_sampled_single_kernel,
            emb_choice=emb_choice, super_emb=super_emb,
            mask_x=mask_x, mask_w=mask_w)
        return pl.pallas_call(
            kernel,
            out_shape=jax.ShapeDtypeStruct((B, O), out_dtype),
            grid_spec=pltpu.PrefetchScalarGridSpec(
                num_scalar_prefetch=0,
                grid=(gm, gn),
                in_specs=[
                    pl.BlockSpec((tm, tk), lambda i, j: (i, 0)),   # x
                    pl.BlockSpec((tn, tk), lambda i, j: (j, 0)),   # weight
                    pl.BlockSpec((1, tn), lambda i, j: (0, j)),    # bias
                ],
                out_specs=pl.BlockSpec((tm, tn), lambda i, j: (i, j)),
            ),
            compiler_params=pltpu.CompilerParams(
                dimension_semantics=("parallel", "parallel")),
            cost_estimate=cost,
        )(x, weight, bias2d)

    kernel = functools.partial(
        _linear_sampled_acc_kernel,
        emb_choice=emb_choice, super_emb=super_emb, tk=tk,
        mask_x=mask_x, mask_w=mask_w)
    return pl.pallas_call(
        kernel,
        out_shape=jax.ShapeDtypeStruct((B, O), out_dtype),
        grid_spec=pltpu.PrefetchScalarGridSpec(
            num_scalar_prefetch=0,
            grid=(gm, gn, gk),
            in_specs=[
                pl.BlockSpec((tm, tk), lambda i, j, k: (i, k)),   # x
                pl.BlockSpec((tn, tk), lambda i, j, k: (j, k)),   # weight
                pl.BlockSpec((1, tn), lambda i, j, k: (0, j)),    # bias
            ],
            out_specs=pl.BlockSpec((tm, tn), lambda i, j, k: (i, j)),
            scratch_shapes=[pltpu.VMEM((tm, tn), jnp.float32)],
        ),
        compiler_params=pltpu.CompilerParams(
            dimension_semantics=("parallel", "parallel", "arbitrary")),
        cost_estimate=cost,
    )(x, weight, bias2d)


if __name__ == "__main__":
    key = jax.random.PRNGKey(0)

    # --- Small demo shapes consistent with the module's forward -------------
    # (hits the single-K, masked-prefix fast path)
    batch, super_emb, emb_choice, out_features = 8, 32, 16, 24
    kx, kw, kb = jax.random.split(key, 3)
    x = jax.random.normal(kx, (batch, super_emb), dtype=jnp.float32)
    weight = jax.random.normal(kw, (out_features, super_emb), dtype=jnp.float32) * 0.02
    bias = jax.random.normal(kb, (out_features,), dtype=jnp.float32) * 0.02

    y = jax.block_until_ready(linear_sampled(x, weight, bias, emb_choice))
    y_ref = x[:, :emb_choice] @ weight[:, :emb_choice].T + bias
    assert y.shape == (batch, out_features)
    assert jnp.allclose(y, y_ref, atol=1e-5, rtol=1e-5)

    # --- Exercise the multi-block (tiled grid + masked K tail) path ----------
    b2, se2, ec2, of2 = 200, 384, 320, 160
    k1, k2, k3 = jax.random.split(jax.random.PRNGKey(1), 3)
    x2 = jax.random.normal(k1, (b2, se2), dtype=jnp.float32)
    w2 = jax.random.normal(k2, (of2, se2), dtype=jnp.float32) * 0.02
    bz2 = jax.random.normal(k3, (of2,), dtype=jnp.float32) * 0.02
    y2 = jax.block_until_ready(
        linear_sampled(x2, w2, bz2, ec2, tm=64, tn=128, tk=128))
    y2_ref = x2[:, :ec2] @ w2[:, :ec2].T + bz2
    assert jnp.allclose(y2, y2_ref, atol=1e-4, rtol=1e-4)

    # --- Default (auto-tiled) path on the same shapes ------------------------
    y2b = jax.block_until_ready(linear_sampled(x2, w2, bz2, ec2))
    assert jnp.allclose(y2b, y2_ref, atol=1e-4, rtol=1e-4)

    # --- bf16-operand / f32-accumulate fast path ------------------------------
    y3 = jax.block_until_ready(
        linear_sampled(x2, w2, bz2, ec2, compute_dtype=jnp.bfloat16,
                       tm=64, tn=128, tk=128))
    assert jnp.allclose(y3, y2_ref, atol=2e-2, rtol=5e-2)

    print("KERNEL_OK")
</pallas_src>

<mosaic_0001>
module attributes {stable_mosaic.version = 11 : i64} {
  func.func @_linear_sampled_single_kernel(%arg0: i32, %arg1: i32, %arg2: memref<8x32xf32, #tpu.memory_space<vmem>>, %arg3: memref<24x32xf32, #tpu.memory_space<vmem>>, %arg4: memref<1x24xf32, #tpu.memory_space<vmem>>, %arg5: memref<8x24xf32, #tpu.memory_space<vmem>>) attributes {dimension_semantics = [#tpu.dimension_semantics<parallel>, #tpu.dimension_semantics<parallel>], iteration_bounds = array<i64: 1, 1>, scalar_prefetch = 0 : i64, scratch_operands = 0 : i64, tpu.core_type = #tpu.core_type<tc>, window_params = [{transform_indices = @transform_0, window_bounds = array<i64: 8, 32>}, {transform_indices = @transform_1, window_bounds = array<i64: 24, 32>}, {transform_indices = @transform_2, window_bounds = array<i64: 1, 24>}, {transform_indices = @transform_3, window_bounds = array<i64: 8, 24>}]} {
    %c0 = arith.constant 0 : index
    %c0_0 = arith.constant 0 : index
    %0 = vector.load %arg2[%c0, %c0_0] : memref<8x32xf32, #tpu.memory_space<vmem>>, vector<8x32xf32>
    %c0_1 = arith.constant 0 : index
    %c0_2 = arith.constant 0 : index
    %1 = vector.load %arg3[%c0_1, %c0_2] : memref<24x32xf32, #tpu.memory_space<vmem>>, vector<24x32xf32>
    %2 = tpu.iota {dimensions = array<i32: 1>} : vector<8x32xi32>
    %c0_i32 = arith.constant 0 : i32
    %3 = vector.broadcast %c0_i32 : i32 to vector<8x32xi32>
    %4 = arith.addi %3, %2 : vector<8x32xi32>
    %c16_i32 = arith.constant 16 : i32
    %5 = vector.broadcast %c16_i32 : i32 to vector<8x32xi32>
    %6 = arith.cmpi slt, %4, %5 : vector<8x32xi32>
    %cst = arith.constant 0.000000e+00 : f32
    %7 = vector.broadcast %cst : f32 to vector<8x32xf32>
    %8 = arith.select %6, %0, %7 : vector<8x32xi1>, vector<8x32xf32>
    %cst_3 = arith.constant dense<0.000000e+00> : vector<8x24xf32>
    %9 = tpu.matmul %8, %1, %cst_3 {dimension_numbers = #tpu.dot_dimension_numbers<[1], [1], [0], [0], [0, 0, 1, 0], [], []>} : vector<8x32xf32>, vector<24x32xf32>, vector<8x24xf32> -> vector<8x24xf32>
    %c0_4 = arith.constant 0 : index
    %c0_5 = arith.constant 0 : index
    %10 = vector.load %arg4[%c0_4, %c0_5] : memref<1x24xf32, #tpu.memory_space<vmem>>, vector<1x24xf32>
    %11 = vector.broadcast %10 : vector<1x24xf32> to vector<8x24xf32>
    %12 = arith.addf %9, %11 : vector<8x24xf32>
    %c0_6 = arith.constant 0 : index
    %c0_7 = arith.constant 0 : index
    %13 = vector.load %arg5[%c0_6, %c0_7] : memref<8x24xf32, #tpu.memory_space<vmem>>, vector<8x24xf32>
    tpu.vector_store %arg5[%c0_6, %c0_7], %12 {strides = array<i32>} : memref<8x24xf32, #tpu.memory_space<vmem>>, vector<8x24xf32>,
    return
  }
  func.func @transform_0(%arg0: i32, %arg1: i32) -> (i32, i32) {
    %c0_i32 = arith.constant 0 : i32
    %c0_i32_0 = arith.constant 0 : i32
    return %arg0, %c0_i32 : i32, i32
  }
  func.func @transform_1(%arg0: i32, %arg1: i32) -> (i32, i32) {
    %c0_i32 = arith.constant 0 : i32
    %c0_i32_0 = arith.constant 0 : i32
    return %arg1, %c0_i32 : i32, i32
  }
  func.func @transform_2(%arg0: i32, %arg1: i32) -> (i32, i32) {
    %c0_i32 = arith.constant 0 : i32
    %c0_i32_0 = arith.constant 0 : i32
    return %c0_i32, %arg1 : i32, i32
  }
  func.func @transform_3(%arg0: i32, %arg1: i32) -> (i32, i32) {
    %c0_i32 = arith.constant 0 : i32
    return %arg0, %arg1 : i32, i32
  }
}

</mosaic_0001>

<bundles_post_ra>
// kernel: tpu_custom_call.1
= control target key start
LH: loop header
LB: loop body
LE: loop exit
PB: predicated region body
PF: predicated region fallthrough
CT: control target
= control target key end

     0   :  { %8 = vsyncpa [#allocation3], 0  ;;  %s333_s0 = inlined_call_operand.hbm [shape: f32[8,32], index: 0, kind: input, shape index: {}]   ;;  %s334_s1 = inlined_call_operand.hbm [shape: f32[24,32], index: 1, kind: input, shape index: {}]   ;;  %s335_s2 = inlined_call_operand.vmem [shape: f32[1,24], index: 2, kind: input, shape index: {}]   ;;  %s336_s3 = inlined_call_operand.hbm [shape: f32[8,24], index: 3, kind: output, shape index: {}]  }
   0x1   :  { %9 = vsyncpa [#allocation6], 0 }
   0x2   :  { %10 = vsyncpa [#allocation4], 0  ;;  %s259_s12 = smov [#allocation2]   ;;  %s260_s14 = smov [#allocation5]  }
   0x3   :  { %s17_s13 = sshll.u32 %s259_s12, 4  ;;  %s26_s15 = sshll.u32 %s260_s14, 4  ;;  %s18_s13 = int_to_ptr.vmem [resolvable:$true] %s17_s13  ;;  %s287_s15 = int_to_ptr.vmem [resolvable:$true] %s26_s15 }
   0x4   :  { %s187_s18 = scalar_lea.hbm %s333_s0, 128 }
   0x5   :  { %p188_p0 = scmp.ne.s32.totalorder %s333_s0, %s187_s18  ;;  %p191_p1 = scmp.lt.u32.totalorder %s187_s18, %s333_s0 }
   0x7   :  { %p193_p2 = pnand %p191_p1, %p188_p0 }
   0x9   :  { %196 = shalt.err (!%p193_p2)
}
   0xa   :  { %s197_s23 = scalar_lea.vmem %s18_s13, 128  ;;  %p202_p4 = scmp.lt.s32.totalorder %s18_s13, %s18_s13 }
   0xb   :  { %p198_p3 = scmp.ne.s32.totalorder %s18_s13, %s197_s23  ;;  %p203_p5 = scmp.lt.s32.totalorder %s197_s23, %s197_s23 }
   0xd   :  { %p204_p6 = por %p203_p5, %p202_p4 }
   0xf   :  { %p205_p7 = pnand %p204_p6, %p198_p3 }
  0x11   :  { %208 = shalt.err (!%p205_p7)
}
  0x12   :  { %20 = dma.hbm_to_vmem [thread:$0]  %s333_s0, 128, %s18_s13, [#allocation3]  }
  0x13   :  { %s209_s28 = scalar_lea.hbm %s334_s1, 384 }
  0x14   :  { %p210_p8 = scmp.ne.s32.totalorder %s334_s1, %s209_s28  ;;  %p213_p9 = scmp.lt.u32.totalorder %s209_s28, %s334_s1 }
  0x16   :  { %p215_p10 = pnand %p213_p9, %p210_p8 }
  0x18   :  { %218 = shalt.err (!%p215_p10)
}
  0x19   :  { %s219_s6 = scalar_lea.vmem %s287_s15, 384  ;;  %p224_p12 = scmp.lt.s32.totalorder %s287_s15, %s287_s15 }
  0x1a   :  { %p220_p11 = scmp.ne.s32.totalorder %s287_s15, %s219_s6  ;;  %p225_p13 = scmp.lt.s32.totalorder %s219_s6, %s219_s6 }
  0x1c   :  { %p226_p0 = por %p225_p13, %p224_p12 }
  0x1e   :  { %p227_p1 = pnand %p226_p0, %p220_p11 }
  0x20   :  { %230 = shalt.err (!%p227_p1)
}
  0x21   :  { %s261_s0 = smov 128   ;;  %s262_s7 = smov 8  }
  0x22   :  { %32 = dma.hbm_to_vmem [thread:$0]  %s334_s1, 384, %s287_s15, [#allocation6], %s261_s0, %s261_s0, %s262_s7  }
  0x23   :  { %253 = dma.done.wait [#allocation3], 128  }
  0x24   :  { %254 = vsyncadd [#allocation3], 4294967168 }
  0x25   :  { %255 = dma.done.wait [#allocation6], 384  }
  0x26   :  { %256 = vsyncadd [#allocation6], 4294966912  ;;  %v263_v0 = vmov 0.0|0.0   ;;  %vm264_vm0 = vmmov 0   ;;  %v265_v1 = vmov 0.0   ;;  %vm56_vm1 = vcmask 261120  }
  0x27   :  { %175 = vmatprep.subr.bf16.mxu0 %v263_v0  ;;  %172 = vmatprep.mubr.msk.f32.mxu0 %vm264_vm0, %v265_v1  ;;  %v42_v2 = vld [vmem:[#allocation5] sm:$0xff]  ;;  %v43_v3 = vld [vmem:[#allocation5 + $0x8] sm:$0xff]  ;;  %vm177_vm2 = vmpackc.low %vm56_vm1, %vm56_vm1  ;;  %v45_v4 = vlaneseq  ;;  %s266_s11 = smov [#allocation7]   ;;  %vm139_vm4 = vcmask 195584  }
  0x28   :  { %v176_v5 = vpack.c.bf16 %v43_v3, %v42_v2  ;;  %v44_v7 = vld [vmem:[#allocation5 + $0x10] sm:$0xff]  ;;  %v41_v8 = vld [vmem:[#allocation2] sm:$0xff]  ;;  %s147_s12 = sshll.u32 %s266_s11, 4  ;;  %s148_s12 = int_to_ptr.vmem [resolvable:$true] %s147_s12 }
  0x29   :  { %v46_v6 = vand.u32 127, %v45_v4  ;;  %v157_v10 = vld [vmem:[%s335_s2] ss:$0 sm:$0xff]  ;;  %s231_s13 = scalar_lea.vmem %s148_s12, 128  ;;  %p236_p3 = scmp.lt.s32.totalorder %s148_s12, %s148_s12 }
  0x2a   :  { %178 = vmatpush3.bf16.xpose.msk.msra.mxu0 %vm177_vm2, %v176_v5  ;;  %p232_p2 = scmp.ne.s32.totalorder %s148_s12, %s231_s13  ;;  %p237_p4 = scmp.lt.s32.totalorder %s231_s13, %s231_s13 }
  0x2b   :  { %170 = vmatprep.subr.mxu0 %v265_v1  ;;  %vm47_vm3 = vcmp.lt.s32.totalorder %v46_v6, 16 }
  0x2c   :  { %v48_v9 = vsel %vm47_vm3, %v41_v8, 0.0  ;;  %p238_p5 = por %p237_p4, %p236_p3 }
  0x2e   :  { %p239_p6 = pnand %p238_p5, %p232_p2 }
  0x32   :  { %171 = vmatpush3.xpose.msk.msra.mxu0 %vm56_vm1, %v44_v7 }
  0x35   :  { %173 = vmatmul.mubr.msk.f32.vlgmr.msra.gmra.mrb[0].mxu0 %vm56_vm1, %v48_v9 }
 0x108   :  { %v135_v11 = vpop.f32.mrb[0].mxu0 }
 0x109   :  { %v136_v12 = vadd.f32 %v157_v10, %v135_v11  ;;  %v174_v13 = vpop.f32.mrb[1].mxu0 }
 0x10b   :  { %140 = vst.msk [vmem:[#allocation7] sm:$0xff] %vm139_vm4, %v136_v12 }
 0x10c   :  { %242 = shalt.err (!%p239_p6)
}
 0x10d   :  { %s243_s16 = scalar_lea.hbm %s336_s3, 128 }
 0x10e   :  { %p244_p7 = scmp.ne.s32.totalorder %s336_s3, %s243_s16  ;;  %p247_p8 = scmp.lt.u32.totalorder %s243_s16, %s336_s3 }
 0x110   :  { %p249_p9 = pnand %p247_p8, %p244_p7 }
 0x112   :  { %252 = shalt.err (!%p249_p9)
}
 0x113   :  { %150 = dma.vmem_to_hbm [thread:$0]  %s148_s12, 128, %s336_s3, [#allocation4]  }
 0x114   :  { %257 = dma.done.wait [#allocation4], 128  }
 0x115   :  { %258 = vsyncadd [#allocation4], 4294967168 }
 0x116   :  { %154 = vsyncpa [#allocation3], 1 }
 0x117   :  { %155 = vsyncpa [#allocation6], 1 }
 0x118   :  { %156 = vsyncpa [#allocation4], 1 }

</bundles_post_ra>
